<compile_context>
chip_gen: v5e
topology: v5e:2x2
jax: 0.10.0
libtpu: 0.0.40
codegen_flags: <defaults>
</compile_context>

<pallas_src>
import math

import jax
import jax.numpy as jnp
from jax.experimental import pallas as pl
from jax.experimental.pallas import tpu as pltpu


# ----------------------------------------------------------------------------
# small helpers
# ----------------------------------------------------------------------------

def _round_up(x, m):
    return ((x + m - 1) // m) * m


def _fullspec(shape):
    """Full-array block (1-D grid) BlockSpec for an arbitrary-rank array."""
    nd = len(shape)
    return pl.BlockSpec(shape, lambda j, _nd=nd: (0,) * _nd)


def _layernorm(x, g, b, eps=1e-5):
    """torch.nn.LayerNorm semantics (biased variance), row-wise."""
    mean = jnp.mean(x, axis=-1, keepdims=True)
    var = jnp.mean((x - mean) ** 2, axis=-1, keepdims=True)
    return (x - mean) * jax.lax.rsqrt(var + eps) * g + b


# Edge axis is a reduction for the node outputs -> 'arbitrary'.  Raise the
# scoped-VMEM limit (v5e default is 16 MiB of 128 MiB physical); 64 MiB also
# fits v7x's 64 MiB physical VMEM.
_CPARAMS = pltpu.CompilerParams(
    dimension_semantics=("arbitrary",),
    vmem_limit_bytes=64 * 1024 * 1024,
)


# ----------------------------------------------------------------------------
# fused Pallas kernels
# ----------------------------------------------------------------------------

def _embed_call(atom, lap, bond, wh, wl, we, bias_pack):
    """h = atom@Wh + lap@Wl + biases ; e = bond@We + be  (one launch)."""
    N, D = atom.shape[0], wh.shape[1]
    E = bond.shape[0]

    def kernel(atom_ref, lap_ref, bond_ref, wh_ref, wl_ref, we_ref, bp_ref,
               h_ref, e_ref):
        h = jnp.dot(atom_ref[...], wh_ref[...],
                    preferred_element_type=jnp.float32) + bp_ref[0:1, :]
        h = h + jnp.dot(lap_ref[...], wl_ref[...],
                        preferred_element_type=jnp.float32) + bp_ref[1:2, :]
        h_ref[...] = h
        e_ref[...] = (jnp.dot(bond_ref[...], we_ref[...],
                              preferred_element_type=jnp.float32) + bp_ref[2:3, :])

    ins = (atom, lap, bond, wh, wl, we, bias_pack)
    out_shape = (jax.ShapeDtypeStruct((N, D), jnp.float32),
                 jax.ShapeDtypeStruct((E, D), jnp.float32))
    return pl.pallas_call(
        kernel,
        out_shape=out_shape,
        grid=(1,),
        in_specs=[_fullspec(a.shape) for a in ins],
        out_specs=tuple(_fullspec(s.shape) for s in out_shape),
        compiler_params=_CPARAMS,
    )(*ins)


def _attn_block_call(h, e, gsrc, gdst, w_stack, v_pack, s_head, b_head,
                     n_heads, *, tile_e):
    """Attention half of a GraphTransformerLayer, edge axis tiled over a grid.

    Fuses: Q/K/V projections, proj_e, edge-endpoint gather (MXU matmul vs 0/1
    incidence tiles), per-edge scores, exp(clamp), segment-sum to dst nodes via
    a transposed matmul on gdst, wV/(z+1e-6), O_h/O_e, residuals, LayerNorm1.
    """
    N, D = h.shape
    E = e.shape[0]
    H = n_heads
    d = D // n_heads
    inv_sqrt_d = 1.0 / math.sqrt(d)
    assert E % tile_e == 0
    n_tiles = E // tile_e

    def kernel(h_ref, e_ref, gsrc_ref, gdst_ref, w_ref, vp_ref, sh_ref, bh_ref,
               hout_ref, eout_ref, q_sc, k_sc, v_sc, wv_sc, z_sc):
        j = pl.program_id(0)

        @pl.when(j == 0)
        def _():
            hv = h_ref[...]
            # Three separate Q/K/V dots (no [N,3D] scratch column slicing);
            # results persist in VMEM scratch across all edge tiles.
            q_sc[...] = jnp.dot(hv, w_ref[0], preferred_element_type=jnp.float32)
            k_sc[...] = jnp.dot(hv, w_ref[1], preferred_element_type=jnp.float32)
            v_sc[...] = jnp.dot(hv, w_ref[2], preferred_element_type=jnp.float32)
            wv_sc[...] = jnp.zeros_like(wv_sc)
            z_sc[...] = jnp.zeros_like(z_sc)

        ev = e_ref[...]                                              # [tE, D]
        # 0/1 incidence / indicator operands travel as bf16 (exact), compute f32
        gsrc_t = gsrc_ref[...].astype(jnp.float32)                   # [tE, N]
        gdst_t = gdst_ref[...].astype(jnp.float32)                   # [tE, N]
        sh = sh_ref[...].astype(jnp.float32)                         # [D, H]
        bh = bh_ref[...].astype(jnp.float32)                         # [H, D]

        pe = jnp.dot(ev, w_ref[3], preferred_element_type=jnp.float32)        # [tE, D]
        q_dst = jnp.dot(gdst_t, q_sc[...], preferred_element_type=jnp.float32)
        k_src = jnp.dot(gsrc_t, k_sc[...], preferred_element_type=jnp.float32)
        v_src = jnp.dot(gsrc_t, v_sc[...], preferred_element_type=jnp.float32)

        # per-edge attention in a head-blocked 2-D [tE, D] layout
        score = (k_src * q_dst) * inv_sqrt_d * pe                    # [tE, D]
        ssum = jnp.dot(score, sh, preferred_element_type=jnp.float32)     # [tE, H]
        s = jnp.exp(jnp.clip(ssum, -5.0, 5.0))                       # [tE, H]
        sv = v_src * jnp.dot(s, bh, preferred_element_type=jnp.float32)   # [tE, D]

        # destination segment-sum for this tile: transposed matmul on gdst
        # (no separate [N, E] adst input), accumulated across edge tiles.
        gdst_T = gdst_t.T                                            # [N, tE]
        wv_sc[...] += jnp.dot(gdst_T, sv, preferred_element_type=jnp.float32)  # [N, D]
        z_sc[...] += jnp.dot(gdst_T, s, preferred_element_type=jnp.float32)    # [N, H]

        # edge output for this tile: O_e + residual + LayerNorm1 (dropout = id)
        e2 = ev + jnp.dot(score, w_ref[5],
                          preferred_element_type=jnp.float32) + vp_ref[1:2, :]
        eout_ref[...] = _layernorm(e2, vp_ref[4:5, :], vp_ref[5:6, :])

        @pl.when(j == pl.num_programs(0) - 1)
        def _():
            z_b = jnp.dot(z_sc[...], bh, preferred_element_type=jnp.float32)  # [N, D]
            # exact reciprocal kept for parity; approx=True would move this to
            # the (free) EUP slot at ~1e-3 relative error.
            h_attn = wv_sc[...] * pl.reciprocal(z_b + 1e-6, approx=False)
            h2 = h_ref[...] + jnp.dot(h_attn, w_ref[4],
                                      preferred_element_type=jnp.float32) + vp_ref[0:1, :]
            hout_ref[...] = _layernorm(h2, vp_ref[2:3, :], vp_ref[3:4, :])

    in_specs = [
        pl.BlockSpec((N, D), lambda j: (0, 0)),            # h (resident)
        pl.BlockSpec((tile_e, D), lambda j: (j, 0)),       # e tile
        pl.BlockSpec((tile_e, N), lambda j: (j, 0)),       # gsrc tile (bf16)
        pl.BlockSpec((tile_e, N), lambda j: (j, 0)),       # gdst tile (bf16)
        pl.BlockSpec((6, D, D), lambda j: (0, 0, 0)),      # Q|K|V|proj_e|O_h|O_e
        pl.BlockSpec((6, D), lambda j: (0, 0)),            # packed bias / LN vectors
        pl.BlockSpec((D, H), lambda j: (0, 0)),            # s_head (bf16)
        pl.BlockSpec((H, D), lambda j: (0, 0)),            # b_head (bf16)
    ]
    out_specs = (
        pl.BlockSpec((N, D), lambda j: (0, 0)),            # hout (resident, written last)
        pl.BlockSpec((tile_e, D), lambda j: (j, 0)),       # eout tile
    )
    out_shape = (jax.ShapeDtypeStruct((N, D), jnp.float32),
                 jax.ShapeDtypeStruct((E, D), jnp.float32))
    return pl.pallas_call(
        kernel,
        out_shape=out_shape,
        grid=(n_tiles,),
        in_specs=in_specs,
        out_specs=out_specs,
        scratch_shapes=[pltpu.VMEM((N, D), jnp.float32),   # q
                        pltpu.VMEM((N, D), jnp.float32),   # k
                        pltpu.VMEM((N, D), jnp.float32),   # v
                        pltpu.VMEM((N, D), jnp.float32),   # wV accumulator
                        pltpu.VMEM((N, H), jnp.float32)],  # z accumulator
        compiler_params=_CPARAMS,
    )(h, e, gsrc, gdst, w_stack, v_pack, s_head, b_head)


def _ffn_block_call(h, e, w1_stack, w2_stack, b1_stack, v_pack, *, tile_e):
    """FFN(h)+LN2+eval-BatchNorm (tile 0) and tiled FFN(e)+LN2 in one launch."""
    N, D = h.shape
    E = e.shape[0]
    assert E % tile_e == 0
    n_tiles = E // tile_e

    def kernel(h_ref, e_ref, w1_ref, w2_ref, b1_ref, vp_ref, hout_ref, eout_ref):
        j = pl.program_id(0)

        @pl.when(j == 0)
        def _():
            hv = h_ref[...]
            hf = jnp.maximum(jnp.dot(hv, w1_ref[0], preferred_element_type=jnp.float32)
                             + b1_ref[0:1, :], 0.0)
            hf = jnp.dot(hf, w2_ref[0], preferred_element_type=jnp.float32) + vp_ref[0:1, :]
            h3 = _layernorm(hv + hf, vp_ref[2:3, :], vp_ref[3:4, :])
            # eval-mode BatchNorm1d folded in as a per-feature affine
            hout_ref[...] = h3 * vp_ref[6:7, :] + vp_ref[7:8, :]

        ev = e_ref[...]
        ef = jnp.maximum(jnp.dot(ev, w1_ref[1], preferred_element_type=jnp.float32)
                         + b1_ref[1:2, :], 0.0)
        ef = jnp.dot(ef, w2_ref[1], preferred_element_type=jnp.float32) + vp_ref[1:2, :]
        eout_ref[...] = _layernorm(ev + ef, vp_ref[4:5, :], vp_ref[5:6, :])

    in_specs = [
        pl.BlockSpec((N, D), lambda j: (0, 0)),                    # h (resident)
        pl.BlockSpec((tile_e, D), lambda j: (j, 0)),               # e tile
        pl.BlockSpec(w1_stack.shape, lambda j: (0, 0, 0)),         # [2, D, 2D]
        pl.BlockSpec(w2_stack.shape, lambda j: (0, 0, 0)),         # [2, 2D, D]
        pl.BlockSpec(b1_stack.shape, lambda j: (0, 0)),            # [2, 2D]
        pl.BlockSpec(v_pack.shape, lambda j: (0, 0)),              # [8, D]
    ]
    out_specs = (
        pl.BlockSpec((N, D), lambda j: (0, 0)),
        pl.BlockSpec((tile_e, D), lambda j: (j, 0)),
    )
    out_shape = (jax.ShapeDtypeStruct((N, D), jnp.float32),
                 jax.ShapeDtypeStruct((E, D), jnp.float32))
    return pl.pallas_call(
        kernel,
        out_shape=out_shape,
        grid=(n_tiles,),
        in_specs=in_specs,
        out_specs=out_specs,
        compiler_params=_CPARAMS,
    )(h, e, w1_stack, w2_stack, b1_stack, v_pack)


# ----------------------------------------------------------------------------
# parameter initialization (deterministic, PyTorch-default-style uniform);
# kernel-friendly packed layout built once here (hoisted out of forward).
# ----------------------------------------------------------------------------

def _init_linear(key, fan_in, fan_out, bias=True):
    k1, k2 = jax.random.split(key)
    bound = 1.0 / math.sqrt(fan_in)
    w = jax.random.uniform(k1, (fan_in, fan_out), jnp.float32, -bound, bound)
    b = (jax.random.uniform(k2, (fan_out,), jnp.float32, -bound, bound)
         if bias else jnp.zeros((fan_out,), jnp.float32))
    return w, b


def init_params(key, node_dim, edge_dim, hidden_dim, out_dim, n_heads, n_layers,
                pos_enc_dim):
    # BatchNorm1d(hidden_dim) is applied to h after every layer -> dims match.
    assert out_dim == hidden_dim, "out_dim must equal hidden_dim (BatchNorm1d(hidden_dim))"
    assert hidden_dim % n_heads == 0
    D = hidden_dim
    keys = jax.random.split(key, 3 + n_layers)
    wh, bh = _init_linear(keys[0], node_dim, D)
    we, be = _init_linear(keys[1], edge_dim, D)
    wl, bl = _init_linear(keys[2], pos_enc_dim, D)
    params = {
        "wh": wh, "wl": wl, "we": we,
        "bias_pack": jnp.stack([bh, bl, be], axis=0),               # [3, D]
        "layers": [],
    }
    ones = jnp.ones((D,), jnp.float32)
    zeros = jnp.zeros((D,), jnp.float32)
    # eval-mode BatchNorm1d with default stats (mean 0, var 1, gamma 1, beta 0)
    # folded into a per-feature affine.
    # TODO(synk): re-fold bn_scale/bn_shift here if loading trained running stats.
    bn_scale = ones * jax.lax.rsqrt(ones + 1e-5)
    bn_shift = zeros
    for li in range(n_layers):
        lk = jax.random.split(keys[3 + li], 10)
        wq, _ = _init_linear(lk[0], D, D, bias=False)
        wk, _ = _init_linear(lk[1], D, D, bias=False)
        wv, _ = _init_linear(lk[2], D, D, bias=False)
        wpe, _ = _init_linear(lk[3], D, D, bias=False)
        woh, boh = _init_linear(lk[4], D, D)
        woe, boe = _init_linear(lk[5], D, D)
        w1h, b1h = _init_linear(lk[6], D, 2 * D)
        w2h, b2h = _init_linear(lk[7], 2 * D, D)
        w1e, b1e = _init_linear(lk[8], D, 2 * D)
        w2e, b2e = _init_linear(lk[9], 2 * D, D)
        params["layers"].append({
            # Q | K | V | proj_e | O_h | O_e (packed once, not per forward call)
            "w_attn": jnp.stack([wq, wk, wv, wpe, woh, woe], axis=0),        # [6, D, D]
            # O_h.b | O_e.b | ln1_h.g | ln1_h.b | ln1_e.g | ln1_e.b
            "v_attn": jnp.stack([boh, boe, ones, zeros, ones, zeros], 0),    # [6, D]
            "w1": jnp.stack([w1h, w1e], axis=0),                             # [2, D, 2D]
            "w2": jnp.stack([w2h, w2e], axis=0),                             # [2, 2D, D]
            "b1": jnp.stack([b1h, b1e], axis=0),                             # [2, 2D]
            # ffn_h2.b | ffn_e2.b | ln2_h.g | ln2_h.b | ln2_e.g | ln2_e.b | bn_scale | bn_shift
            "v_ffn": jnp.stack([b2h, b2e, ones, zeros, ones, zeros,
                                bn_scale, bn_shift], axis=0),                # [8, D]
        })
    return params


# ----------------------------------------------------------------------------
# forward pass
# ----------------------------------------------------------------------------

def graph_transformer_forward(params, atom, lap_pos_enc, bond, src, dst,
                              n_heads, *, edge_tile=256):
    N = atom.shape[0]
    D = params["wh"].shape[1]
    d = D // n_heads
    E = bond.shape[0]

    # Edge-row tiling (multiples of 16 keep bf16 sublane tiling happy); pad E
    # and neutralize padded edges with all-zero incidence rows.
    tile_e = min(edge_tile, _round_up(E, 16))
    tile_e = max(16, (tile_e // 16) * 16)
    E_pad = _round_up(E, tile_e)
    pad = E_pad - E
    bond_p = jnp.pad(bond, ((0, pad), (0, 0))) if pad else bond
    src_p = jnp.concatenate([src, jnp.full((pad,), -1, jnp.int32)]) if pad else src
    dst_p = jnp.concatenate([dst, jnp.full((pad,), -1, jnp.int32)]) if pad else dst

    # 0/1 incidence matrices in bf16 (exact) so the graph gather / segment-sum
    # becomes MXU matmuls inside the fused kernels.
    # TODO(synk): for non-toy graphs (N >= ~1k, E >= ~10k) replace the dense
    # [E,N] incidence with scalar-prefetched src/dst indices
    # (PrefetchScalarGridSpec) and in-kernel gather / segment accumulation.
    node_ids = jnp.arange(N, dtype=jnp.int32)
    gsrc = (src_p[:, None] == node_ids[None, :]).astype(jnp.bfloat16)   # [E_pad, N]
    gdst = (dst_p[:, None] == node_ids[None, :]).astype(jnp.bfloat16)   # [E_pad, N]

    # static per-head block-sum / block-broadcast indicators (exact in bf16)
    head_of_feat = jnp.arange(D, dtype=jnp.int32) // d
    s_head = (head_of_feat[:, None] ==
              jnp.arange(n_heads, dtype=jnp.int32)[None, :]).astype(jnp.bfloat16)  # [D, H]
    b_head = s_head.T                                                               # [H, D]

    h, e = _embed_call(atom, lap_pos_enc, bond_p,
                       params["wh"], params["wl"], params["we"],
                       params["bias_pack"])
    # in_feat_dropout: identity (eval mode)

    for lp in params["layers"]:
        h, e = _attn_block_call(h, e, gsrc, gdst, lp["w_attn"], lp["v_attn"],
                                s_head, b_head, n_heads, tile_e=tile_e)
        h, e = _ffn_block_call(h, e, lp["w1"], lp["w2"], lp["b1"], lp["v_ffn"],
                               tile_e=tile_e)
    return h


# ----------------------------------------------------------------------------
# example run
# ----------------------------------------------------------------------------

if __name__ == "__main__":
    key = jax.random.PRNGKey(0)

    N = 16                 # nodes
    node_dim = 9           # atom feature dim
    edge_dim = 4           # bond feature dim
    pos_enc_dim = 8        # laplacian positional encoding dim
    hidden_dim = 32        # lane-sparse at 32; prefer multiples of 128 at scale
    out_dim = 32           # must equal hidden_dim (BatchNorm1d(hidden_dim))
    n_heads = 4
    n_layers = 2

    # Small deterministic graph: ring + chords (3 outgoing edges per node).
    src_list, dst_list = [], []
    for i in range(N):
        for off in (1, 2, N - 1):
            src_list.append(i)
            dst_list.append((i + off) % N)
    src = jnp.array(src_list, dtype=jnp.int32)
    dst = jnp.array(dst_list, dtype=jnp.int32)
    E = int(src.shape[0])

    k_atom, k_lap, k_bond, k_param = jax.random.split(key, 4)
    atom = jax.random.normal(k_atom, (N, node_dim), jnp.float32)
    lap_pos_enc = jax.random.normal(k_lap, (N, pos_enc_dim), jnp.float32)
    bond = jax.random.normal(k_bond, (E, edge_dim), jnp.float32)

    params = init_params(k_param, node_dim, edge_dim, hidden_dim, out_dim,
                         n_heads, n_layers, pos_enc_dim)

    # edge_tile=16 exercises the multi-step edge pipeline even at toy E=48;
    # keep the default (256) at production sizes.
    h_out = graph_transformer_forward(params, atom, lap_pos_enc, bond, src, dst,
                                      n_heads, edge_tile=16)
    h_out = jax.block_until_ready(h_out)

    assert h_out.shape == (N, out_dim), h_out.shape
    assert bool(jnp.all(jnp.isfinite(h_out)))
    # TODO(synk): DGL graph bookkeeping (g.ndata['h'] = h) has no Pallas
    # equivalent; the node-feature array h_out IS that output.
    print("KERNEL_OK")
</pallas_src>

<mosaic_0001>
module attributes {stable_mosaic.version = 11 : i64} {
  func.func @kernel(%arg0: i32, %arg1: memref<16x9xf32, #tpu.memory_space<vmem>>, %arg2: memref<16x8xf32, #tpu.memory_space<vmem>>, %arg3: memref<48x4xf32, #tpu.memory_space<vmem>>, %arg4: memref<9x32xf32, #tpu.memory_space<vmem>>, %arg5: memref<8x32xf32, #tpu.memory_space<vmem>>, %arg6: memref<4x32xf32, #tpu.memory_space<vmem>>, %arg7: memref<3x32xf32, #tpu.memory_space<vmem>>, %arg8: memref<16x32xf32, #tpu.memory_space<vmem>>, %arg9: memref<48x32xf32, #tpu.memory_space<vmem>>) attributes {dimension_semantics = [#tpu.dimension_semantics<arbitrary>], iteration_bounds = array<i64: 1>, scalar_prefetch = 0 : i64, scratch_operands = 0 : i64, tpu.core_type = #tpu.core_type<tc>, window_params = [{pipeline_mode = #tpu.pipeline_mode<synchronous>, transform_indices = @transform_0, window_bounds = array<i64: 16, 9>}, {pipeline_mode = #tpu.pipeline_mode<synchronous>, transform_indices = @transform_1, window_bounds = array<i64: 16, 8>}, {pipeline_mode = #tpu.pipeline_mode<synchronous>, transform_indices = @transform_2, window_bounds = array<i64: 48, 4>}, {pipeline_mode = #tpu.pipeline_mode<synchronous>, transform_indices = @transform_3, window_bounds = array<i64: 9, 32>}, {pipeline_mode = #tpu.pipeline_mode<synchronous>, transform_indices = @transform_4, window_bounds = array<i64: 8, 32>}, {pipeline_mode = #tpu.pipeline_mode<synchronous>, transform_indices = @transform_5, window_bounds = array<i64: 4, 32>}, {pipeline_mode = #tpu.pipeline_mode<synchronous>, transform_indices = @transform_6, window_bounds = array<i64: 3, 32>}, {pipeline_mode = #tpu.pipeline_mode<synchronous>, transform_indices = @transform_7, window_bounds = array<i64: 16, 32>}, {pipeline_mode = #tpu.pipeline_mode<synchronous>, transform_indices = @transform_8, window_bounds = array<i64: 48, 32>}]} {
    %c0 = arith.constant 0 : index
    %c0_0 = arith.constant 0 : index
    %0 = vector.load %arg1[%c0, %c0_0] : memref<16x9xf32, #tpu.memory_space<vmem>>, vector<16x9xf32>
    %c0_1 = arith.constant 0 : index
    %c0_2 = arith.constant 0 : index
    %1 = vector.load %arg4[%c0_1, %c0_2] : memref<9x32xf32, #tpu.memory_space<vmem>>, vector<9x32xf32>
    %cst = arith.constant dense<0.000000e+00> : vector<16x32xf32>
    %2 = tpu.matmul %0, %1, %cst {dimension_numbers = #tpu.dot_dimension_numbers<[1], [0], [0], [1], [0, 0, 1, 1], [], []>} : vector<16x9xf32>, vector<9x32xf32>, vector<16x32xf32> -> vector<16x32xf32>
    %c0_3 = arith.constant 0 : index
    %c0_4 = arith.constant 0 : index
    %3 = vector.load %arg7[%c0_3, %c0_4] : memref<3x32xf32, #tpu.memory_space<vmem>>, vector<1x32xf32>
    %4 = vector.broadcast %3 : vector<1x32xf32> to vector<16x32xf32>
    %5 = arith.addf %2, %4 : vector<16x32xf32>
    %c0_5 = arith.constant 0 : index
    %c0_6 = arith.constant 0 : index
    %6 = vector.load %arg2[%c0_5, %c0_6] : memref<16x8xf32, #tpu.memory_space<vmem>>, vector<16x8xf32>
    %c0_7 = arith.constant 0 : index
    %c0_8 = arith.constant 0 : index
    %7 = vector.load %arg5[%c0_7, %c0_8] : memref<8x32xf32, #tpu.memory_space<vmem>>, vector<8x32xf32>
    %cst_9 = arith.constant dense<0.000000e+00> : vector<16x32xf32>
    %8 = tpu.matmul %6, %7, %cst_9 {dimension_numbers = #tpu.dot_dimension_numbers<[1], [0], [0], [1], [0, 0, 1, 1], [], []>} : vector<16x8xf32>, vector<8x32xf32>, vector<16x32xf32> -> vector<16x32xf32>
    %9 = arith.addf %5, %8 : vector<16x32xf32>
    %c1 = arith.constant 1 : index
    %c0_10 = arith.constant 0 : index
    %10 = vector.load %arg7[%c1, %c0_10] : memref<3x32xf32, #tpu.memory_space<vmem>>, vector<1x32xf32>
    %11 = vector.broadcast %10 : vector<1x32xf32> to vector<16x32xf32>
    %12 = arith.addf %9, %11 : vector<16x32xf32>
    %c0_11 = arith.constant 0 : index
    %c0_12 = arith.constant 0 : index
    %13 = vector.load %arg8[%c0_11, %c0_12] : memref<16x32xf32, #tpu.memory_space<vmem>>, vector<16x32xf32>
    tpu.vector_store %arg8[%c0_11, %c0_12], %12 {strides = array<i32>} : memref<16x32xf32, #tpu.memory_space<vmem>>, vector<16x32xf32>,
    %c0_13 = arith.constant 0 : index
    %c0_14 = arith.constant 0 : index
    %14 = vector.load %arg3[%c0_13, %c0_14] : memref<48x4xf32, #tpu.memory_space<vmem>>, vector<48x4xf32>
    %c0_15 = arith.constant 0 : index
    %c0_16 = arith.constant 0 : index
    %15 = vector.load %arg6[%c0_15, %c0_16] : memref<4x32xf32, #tpu.memory_space<vmem>>, vector<4x32xf32>
    %cst_17 = arith.constant dense<0.000000e+00> : vector<48x32xf32>
    %16 = tpu.matmul %14, %15, %cst_17 {dimension_numbers = #tpu.dot_dimension_numbers<[1], [0], [0], [1], [0, 0, 1, 1], [], []>} : vector<48x4xf32>, vector<4x32xf32>, vector<48x32xf32> -> vector<48x32xf32>
    %c2 = arith.constant 2 : index
    %c0_18 = arith.constant 0 : index
    %17 = vector.load %arg7[%c2, %c0_18] : memref<3x32xf32, #tpu.memory_space<vmem>>, vector<1x32xf32>
    %18 = vector.broadcast %17 : vector<1x32xf32> to vector<48x32xf32>
    %19 = arith.addf %16, %18 : vector<48x32xf32>
    %c0_19 = arith.constant 0 : index
    %c0_20 = arith.constant 0 : index
    %20 = vector.load %arg9[%c0_19, %c0_20] : memref<48x32xf32, #tpu.memory_space<vmem>>, vector<48x32xf32>
    tpu.vector_store %arg9[%c0_19, %c0_20], %19 {strides = array<i32>} : memref<48x32xf32, #tpu.memory_space<vmem>>, vector<48x32xf32>,
    return
  }
  func.func @transform_0(%arg0: i32) -> (i32, i32) {
    %c0_i32 = arith.constant 0 : i32
    %c0_i32_0 = arith.constant 0 : i32
    %c0_i32_1 = arith.constant 0 : i32
    return %c0_i32, %c0_i32_0 : i32, i32
  }
  func.func @transform_1(%arg0: i32) -> (i32, i32) {
    %c0_i32 = arith.constant 0 : i32
    %c0_i32_0 = arith.constant 0 : i32
    %c0_i32_1 = arith.constant 0 : i32
    return %c0_i32, %c0_i32_0 : i32, i32
  }
  func.func @transform_2(%arg0: i32) -> (i32, i32) {
    %c0_i32 = arith.constant 0 : i32
    %c0_i32_0 = arith.constant 0 : i32
    %c0_i32_1 = arith.constant 0 : i32
    return %c0_i32, %c0_i32_0 : i32, i32
  }
  func.func @transform_3(%arg0: i32) -> (i32, i32) {
    %c0_i32 = arith.constant 0 : i32
    %c0_i32_0 = arith.constant 0 : i32
    %c0_i32_1 = arith.constant 0 : i32
    return %c0_i32, %c0_i32_0 : i32, i32
  }
  func.func @transform_4(%arg0: i32) -> (i32, i32) {
    %c0_i32 = arith.constant 0 : i32
    %c0_i32_0 = arith.constant 0 : i32
    %c0_i32_1 = arith.constant 0 : i32
    return %c0_i32, %c0_i32_0 : i32, i32
  }
  func.func @transform_5(%arg0: i32) -> (i32, i32) {
    %c0_i32 = arith.constant 0 : i32
    %c0_i32_0 = arith.constant 0 : i32
    %c0_i32_1 = arith.constant 0 : i32
    return %c0_i32, %c0_i32_0 : i32, i32
  }
  func.func @transform_6(%arg0: i32) -> (i32, i32) {
    %c0_i32 = arith.constant 0 : i32
    %c0_i32_0 = arith.constant 0 : i32
    %c0_i32_1 = arith.constant 0 : i32
    return %c0_i32, %c0_i32_0 : i32, i32
  }
  func.func @transform_7(%arg0: i32) -> (i32, i32) {
    %c0_i32 = arith.constant 0 : i32
    %c0_i32_0 = arith.constant 0 : i32
    %c0_i32_1 = arith.constant 0 : i32
    return %c0_i32, %c0_i32_0 : i32, i32
  }
  func.func @transform_8(%arg0: i32) -> (i32, i32) {
    %c0_i32 = arith.constant 0 : i32
    %c0_i32_0 = arith.constant 0 : i32
    %c0_i32_1 = arith.constant 0 : i32
    return %c0_i32, %c0_i32_0 : i32, i32
  }
}

</mosaic_0001>

<bundles_post_ra>
// kernel: tpu_custom_call.1
= control target key start
LH: loop header
LB: loop body
LE: loop exit
PB: predicated region body
PF: predicated region fallthrough
CT: control target
= control target key end

     0   :  { %vm139_vm0 = vcmask 1043456   ;;  %vm120_vm1 = vcmask 31744   ;;  %vm42_vm2 = vcmask 1040384   ;;  %vm72_vm3 = vcmask 64512   ;;  %s387_s0 = inlined_call_operand.vmem [shape: f32[16,9], index: 0, kind: input, shape index: {}]   ;;  %s388_s1 = inlined_call_operand.vmem [shape: f32[16,8], index: 1, kind: input, shape index: {}]   ;;  %s389_s2 = inlined_call_operand.vmem [shape: f32[48,4], index: 2, kind: input, shape index: {}]   ;;  %s390_s3 = inlined_call_operand.vmem [shape: f32[9,32], index: 3, kind: input, shape index: {}]   ;;  %s391_s4 = inlined_call_operand.vmem [shape: f32[8,32], index: 4, kind: input, shape index: {}]   ;;  %s392_s5 = inlined_call_operand.vmem [shape: f32[4,32], index: 5, kind: input, shape index: {}]   ;;  %s393_s6 = inlined_call_operand.vmem [shape: f32[3,32], index: 6, kind: input, shape index: {}]   ;;  %s394_s7 = inlined_call_operand.hbm [shape: f32[16,32], index: 7, kind: output, shape index: {0}]   ;;  %s395_s8 = inlined_call_operand.vmem [shape: f32[48,32], index: 8, kind: output, shape index: {1}]  }
   0x1   :  { %v117_v0 = vld [vmem:[%s392_s5] sm:$0xf]  ;;  %v114_v2 = vld [vmem:[%s389_s2 + $0x18] sm:$0xff]  ;;  %v32_v3 = vld [vmem:[%s390_s3 + $0x8] sm:$0x1]  ;;  %vm35_vm4 = vcmask 72704  }
   0x2   :  { %v111_v1 = vld [vmem:[%s389_s2] sm:$0xff]  ;;  %211 = vmatpush.msk.msra.mxu2 %vm139_vm0, %v117_v0  ;;  %218 = vmatpush.msk.msra.mxu3 %vm139_vm0, %v117_v0 }
   0x3   :  { %212 = vmatmul.msk.f32.vlgmr.msra.gmra.mxu2 %vm120_vm1, %v111_v1  ;;  %215 = vmatmul.msk.f32.vlgmr.msra.gmra.mxu3 %vm120_vm1, %v114_v2  ;;  %v31_v4 = vld [vmem:[%s390_s3] sm:$0xff] }
   0x4   :  { %v71_v5 = vld [vmem:[%s391_s4] sm:$0xff]  ;;  %206 = vmatpush.msk.msra.mxu0 %vm42_vm2, %v32_v3 }
   0x5   :  { %v29_v6 = vld [vmem:[%s387_s0] sm:$0xff]  ;;  %94 = vmatpush.msra.mxu1 %v71_v5 }
   0x6   :  { %v69_v7 = vld [vmem:[%s388_s1] sm:$0xff]  ;;  %61 = vmatpush.msra.mxu0 %v31_v4 }
   0x7   :  { %209 = vmatmul.msk.f32.vlgmr.msra.gmra.mxu1 %vm72_vm3, %v69_v7  ;;  %207 = vmatmul.msk.f32.vlgmr.msra.gmra.mxu0 %vm35_vm4, %v29_v6 }
   0x8   :  { %14 = vsyncpa [#allocation3], 0  ;;  %v112_v8 = vld [vmem:[%s389_s2 + $0x8] sm:$0xff]  ;;  %v115_v9 = vld [vmem:[%s389_s2 + $0x20] sm:$0xff]  ;;  %vm108_vm5 = vcmask 261120   ;;  %s190_s17 = sshll.u32 %s394_s7, 4  ;;  %s191_s17 = int_to_ptr.hbm [resolvable:$true] %s190_s17 }
   0x9   :  { %v70_v10 = vld [vmem:[%s388_s1 + $0x8] sm:$0xff]  ;;  %v113_v12 = vld [vmem:[%s389_s2 + $0x10] sm:$0xff]  ;;  %v223_v14 = vld [vmem:[%s393_s6] ss:$0 sm:$0xff]  ;;  %s252_s7 = smov 128   ;;  %s253_s4 = smov 8  }
   0xa   :  { %v30_v11 = vld [vmem:[%s387_s0 + $0x8] sm:$0xff]  ;;  %v222_v16 = vld [vmem:[%s393_s6 + $0x2] ss:$0 sm:$0xff]  ;;  %v224_v19 = vld [vmem:[%s393_s6 + $0x1] ss:$0 sm:$0xff]  ;;  %s251_s6 = smov [#allocation2]  }
   0xb   :  { %213 = vmatmul.msk.f32.gmra.mxu2 %vm120_vm1, %v112_v8  ;;  %216 = vmatmul.msk.f32.gmra.mxu3 %vm120_vm1, %v115_v9  ;;  %v116_v13 = vld [vmem:[%s389_s2 + $0x28] sm:$0xff]  ;;  %s188_s14 = sshll.u32 %s251_s6, 4  ;;  %s189_s14 = int_to_ptr.vmem [resolvable:$true] %s188_s14 }
   0xf   :  { %210 = vmatmul.msk.f32.gmra.mxu1 %vm72_vm3, %v70_v10  ;;  %208 = vmatmul.msk.f32.gmra.mxu0 %vm35_vm4, %v30_v11 }
  0x13   :  { %214 = vmatmul.msk.f32.gmra.mxu2 %vm120_vm1, %v113_v12  ;;  %217 = vmatmul.msk.f32.gmra.mxu3 %vm120_vm1, %v116_v13 }
  0x84   :  { %v96_v15 = vpop.f32.mrf.mxu1  ;;  %v63_v17 = vpop.f32.mrf.mxu0 }
  0x85   :  { %v64_v18 = vadd.f32 %v223_v14, %v63_v17 }
  0x86   :  { %v160_v20 = vpop.f32.mrf.mxu2  ;;  %v169_v21 = vpop.f32.mrf.mxu3 }
  0x87   :  { %v161_v22 = vadd.f32 %v222_v16, %v160_v20  ;;  %v170_v23 = vadd.f32 %v222_v16, %v169_v21  ;;  %v102_v24 = vadd.f32 %v96_v15, %v64_v18 }
  0x89   :  { %178 = vst.msk [vmem:[%s395_s8] sm:$0xff] %vm108_vm5, %v161_v22  ;;  %v106_v25 = vadd.f32 %v224_v19, %v102_v24 }
  0x8a   :  { %181 = vst.msk [vmem:[%s395_s8 + $0x18] sm:$0xff] %vm108_vm5, %v170_v23 }
  0x8b   :  { %109 = vst.msk [vmem:[#allocation2] sm:$0xff] %vm108_vm5, %v106_v25 }
  0x8c   :  { %v66_v26 = vpop.f32.mrf.mxu0  ;;  %v99_v27 = vpop.f32.mrf.mxu1 }
  0x8d   :  { %v67_v28 = vadd.f32 %v223_v14, %v66_v26 }
  0x8e   :  { %v163_v29 = vpop.f32.mrf.mxu2  ;;  %v172_v30 = vpop.f32.mrf.mxu3 }
  0x8f   :  { %v164_v31 = vadd.f32 %v222_v16, %v163_v29  ;;  %v173_v32 = vadd.f32 %v222_v16, %v172_v30  ;;  %v103_v33 = vadd.f32 %v99_v27, %v67_v28 }
  0x91   :  { %179 = vst.msk [vmem:[%s395_s8 + $0x8] sm:$0xff] %vm108_vm5, %v164_v31  ;;  %v107_v34 = vadd.f32 %v224_v19, %v103_v33 }
  0x92   :  { %182 = vst.msk [vmem:[%s395_s8 + $0x20] sm:$0xff] %vm108_vm5, %v173_v32 }
  0x93   :  { %110 = vst.msk [vmem:[#allocation2 + $0x8] sm:$0xff] %vm108_vm5, %v107_v34 }
  0x94   :  { %196 = dma.vmem_to_hbm [thread:$0]  %s189_s14, 256, %s191_s17, [#allocation3], %s252_s7, %s252_s7, %s253_s4  }
  0x96   :  { %v166_v35 = vpop.f32.mrf.mxu2  ;;  %v175_v36 = vpop.f32.mrf.mxu3 }
  0x97   :  { %v167_v37 = vadd.f32 %v222_v16, %v166_v35  ;;  %v176_v38 = vadd.f32 %v222_v16, %v175_v36 }
  0x99   :  { %180 = vst.msk [vmem:[%s395_s8 + $0x10] sm:$0xff] %vm108_vm5, %v167_v37 }
  0x9a   :  { %183 = vst.msk [vmem:[%s395_s8 + $0x28] sm:$0xff] %vm108_vm5, %v176_v38 }
  0x9b   :  { %249 = dma.done.wait [#allocation3], 256  }
  0x9c   :  { %250 = vsyncadd [#allocation3], 4294967040 }
  0x9d   :  { %205 = vsyncpa [#allocation3], 1 }

</bundles_post_ra>
